<compile_context>
chip_gen: v7x
topology: tpu7x:2x2x1
jax: 0.10.0
libtpu: 0.0.40
codegen_flags: <defaults>
</compile_context>

<pallas_src>
import jax
import jax.numpy as jnp
from jax.experimental import pallas as pl
from jax.experimental.pallas import tpu as pltpu


def _scale_mul_block_kernel(x_ref, s_ref, o_ref):
    # Per-block scale path (ragged fallback): s_ref is already the matching
    # (bn, 1) rows; Pallas masks the tail block.
    o_ref[...] = (x_ref[...] * s_ref[...]).astype(o_ref.dtype)


def _make_resident_scale_kernel(bn):
    # Whole scale kept resident in VMEM (same block index every step, so it is
    # DMA'd once); slice the bn rows belonging to this grid step.
    def kernel(x_ref, s_ref, o_ref):
        start = pl.multiple_of(pl.program_id(0) * bn, 8)
        o_ref[...] = (x_ref[...] * s_ref[pl.ds(start, bn), :]).astype(o_ref.dtype)

    return kernel


def _sublane_granularity(dtype):
    # f32 -> 8, bf16 -> 16, int8/fp8 -> 32 (sub-32-bit dtypes pack along sublanes).
    return max(8, 32 // jnp.dtype(dtype).itemsize)


def _num_tensorcores():
    # v7x has 2 TensorCores per chip; v5e/v6e have 1. Fall back to 1 if unknown.
    try:
        info = pltpu.get_tpu_info()
        for attr in ("num_cores", "tensor_cores_per_chip", "num_tensorcores",
                     "cores_per_chip"):
            v = getattr(info, attr, None)
            if isinstance(v, int) and v > 0:
                return v
    except Exception:
        pass
    try:
        v = getattr(jax.devices()[0], "num_cores", None)
        if isinstance(v, int) and v > 0:
            return v
    except Exception:
        pass
    return 1


def _pick_block_rows(nc, hw, dtype, num_cores, max_tile_bytes=4 << 20):
    """Row-tile size: fewest grid steps that fit ~4 MB/buffer; on multi-TC
    chips prefer one equal, sublane-aligned, unmasked tile per core."""
    sub = _sublane_granularity(dtype)
    item = jnp.dtype(dtype).itemsize
    # Even split across TensorCores (v7x megacore) when it stays aligned & fits.
    if num_cores > 1 and nc % (num_cores * sub) == 0:
        bn = nc // num_cores
        if bn * hw * item <= max_tile_bytes:
            return bn
    # Single step if the whole thing fits the VMEM budget (or nc is tiny).
    if nc * hw * item <= max_tile_bytes or nc <= sub:
        return nc
    # Otherwise: largest sublane-aligned tile within the budget.
    bn = max(sub, (max_tile_bytes // (hw * item)) // sub * sub)
    return min(bn, nc)


def scale_mul(x, scale):
    """x: (N, C, H, W), scale: (N, C, 1, 1) -> x * scale (broadcast)."""
    n, c, h, w = x.shape
    nc, hw = n * c, h * w
    x2d = x.reshape(nc, hw)
    s2d = scale.reshape(nc, 1)

    bn = _pick_block_rows(nc, hw, x.dtype, _num_tensorcores())
    grid_n = pl.cdiv(nc, bn)

    if nc % bn == 0:
        # Resident-scale path: one (nc, 1) DMA total, in-kernel row slice.
        kernel = _make_resident_scale_kernel(bn)
        s_spec = pl.BlockSpec((nc, 1), lambda i: (0, 0))
    else:
        # Ragged tail: let Pallas mask the per-block scale fetch.
        kernel = _scale_mul_block_kernel
        s_spec = pl.BlockSpec((bn, 1), lambda i: (i, 0))

    out2d = pl.pallas_call(
        kernel,
        out_shape=jax.ShapeDtypeStruct((nc, hw), x.dtype),
        grid=(grid_n,),
        in_specs=[
            pl.BlockSpec((bn, hw), lambda i: (i, 0)),
            s_spec,
        ],
        out_specs=pl.BlockSpec((bn, hw), lambda i: (i, 0)),
        compiler_params=pltpu.CompilerParams(
            dimension_semantics=("parallel",),
        ),
    )(x2d, s2d)

    return out2d.reshape(n, c, h, w)


if __name__ == "__main__":
    key = jax.random.PRNGKey(0)
    k1, k2 = jax.random.split(key)

    # Shapes from the module's forward: x268=[1,480,14,14], x273=[1,480,1,1]
    x268 = jax.random.normal(k1, (1, 480, 14, 14), dtype=jnp.float32)
    x273 = jax.random.normal(k2, (1, 480, 1, 1), dtype=jnp.float32)

    # Reference (plain-JAX broadcast multiply)
    ref = x268 * x273

    out = scale_mul(x268, x273)
    jax.block_until_ready(out)

    assert out.shape == (1, 480, 14, 14)
    assert jnp.allclose(out, ref, atol=1e-6, rtol=1e-6)

    print("KERNEL_OK")
</pallas_src>

<mosaic_0001>
module attributes {stable_mosaic.version = 11 : i64} {
  func.func @kernel(%arg0: i32, %arg1: memref<480x196xf32, #tpu.memory_space<vmem>>, %arg2: memref<480x1xf32, #tpu.memory_space<vmem>>, %arg3: memref<480x196xf32, #tpu.memory_space<vmem>>) attributes {dimension_semantics = [#tpu.dimension_semantics<parallel>], iteration_bounds = array<i64: 1>, scalar_prefetch = 0 : i64, scratch_operands = 0 : i64, tpu.core_type = #tpu.core_type<tc>, window_params = [{transform_indices = @transform_0, window_bounds = array<i64: 480, 196>}, {pipeline_mode = #tpu.pipeline_mode<synchronous>, transform_indices = @transform_1, window_bounds = array<i64: 480, 1>}, {transform_indices = @transform_2, window_bounds = array<i64: 480, 196>}]} {
    %c480_i32 = arith.constant 480 : i32
    %0 = arith.muli %arg0, %c480_i32 : i32
    %1 = tpu.assume_multiple %0, 8 : i32
    %c0 = arith.constant 0 : index
    %c0_0 = arith.constant 0 : index
    %2 = vector.load %arg1[%c0, %c0_0] : memref<480x196xf32, #tpu.memory_space<vmem>>, vector<480x196xf32>
    %3 = arith.index_cast %1 : i32 to index
    %c0_1 = arith.constant 0 : index
    %4 = vector.load %arg2[%3, %c0_1] : memref<480x1xf32, #tpu.memory_space<vmem>>, vector<480x1xf32>
    %5 = vector.broadcast %4 : vector<480x1xf32> to vector<480x196xf32>
    %6 = arith.mulf %2, %5 : vector<480x196xf32>
    %c0_2 = arith.constant 0 : index
    %c0_3 = arith.constant 0 : index
    %7 = vector.load %arg3[%c0_2, %c0_3] : memref<480x196xf32, #tpu.memory_space<vmem>>, vector<480x196xf32>
    tpu.vector_store %arg3[%c0_2, %c0_3], %6 {strides = array<i32>} : memref<480x196xf32, #tpu.memory_space<vmem>>, vector<480x196xf32>,
    return
  }
  func.func @transform_0(%arg0: i32) -> (i32, i32) {
    %c0_i32 = arith.constant 0 : i32
    %c0_i32_0 = arith.constant 0 : i32
    return %arg0, %c0_i32 : i32, i32
  }
  func.func @transform_1(%arg0: i32) -> (i32, i32) {
    %c0_i32 = arith.constant 0 : i32
    %c0_i32_0 = arith.constant 0 : i32
    %c0_i32_1 = arith.constant 0 : i32
    return %c0_i32, %c0_i32_0 : i32, i32
  }
  func.func @transform_2(%arg0: i32) -> (i32, i32) {
    %c0_i32 = arith.constant 0 : i32
    %c0_i32_0 = arith.constant 0 : i32
    return %arg0, %c0_i32 : i32, i32
  }
}

</mosaic_0001>

<bundles_post_ra>
// kernel: tpu_custom_call.1
= control target key start
LH: loop header
LB: loop body
LE: loop exit
PB: predicated region body
PF: predicated region fallthrough
CT: control target
= control target key end

     0   :  { %v741_v0 = vmov 0   ;;  %vm614_vm0 = vcmask 556032   ;;  %s1717_s1 = inlined_call_operand.vmem [shape: f32[480,1], index: 1, kind: input, shape index: {}]   ;;  %s1718_s0 = inlined_call_operand.vmem [shape: f32[480,196], index: 0, kind: input, shape index: {}]   ;;  %s1719_s2 = inlined_call_operand.vmem [shape: f32[480,196], index: 2, kind: output, shape index: {}]  }
   0x1   :  { %740 = vset.pattern.permute.xlu1 %v741_v0  ;;  %739 = vset.pattern.permute.xlu0 %v741_v0  ;;  %v135_v1 = vld [vmem:[%s1717_s1 + $0x10] sm:$0xff]  ;;  %v133_v2 = vld [vmem:[%s1717_s1] sm:$0xff]  ;;  %v136_v3 = vld [vmem:[%s1717_s1 + $0x18] sm:$0xff] }
   0x2   :  { %205 = vperm.xlu1 %740, %v135_v1   ;;  %195 = vperm.xlu0 %739, %v133_v2   ;;  %v134_v4 = vld [vmem:[%s1717_s1 + $0x8] sm:$0xff]  ;;  %v137_v6 = vld [vmem:[%s1717_s1 + $0x20] sm:$0xff]  ;;  %v140_v7 = vld [vmem:[%s1717_s1 + $0x38] sm:$0xff] }
   0x3   :  { %v138_v5 = vld [vmem:[%s1717_s1 + $0x28] sm:$0xff]  ;;  %v139_v8 = vld [vmem:[%s1717_s1 + $0x30] sm:$0xff]  ;;  %v141_v10 = vld [vmem:[%s1717_s1 + $0x40] sm:$0xff] }
   0x4   :  { %v142_v9 = vld [vmem:[%s1717_s1 + $0x48] sm:$0xff]  ;;  %v144_v11 = vld [vmem:[%s1717_s1 + $0x58] sm:$0xff]  ;;  %v143_v12 = vld [vmem:[%s1717_s1 + $0x50] sm:$0xff] }
   0x5   :  { %v146_v13 = vld [vmem:[%s1717_s1 + $0x68] sm:$0xff]  ;;  %v145_v14 = vld [vmem:[%s1717_s1 + $0x60] sm:$0xff]  ;;  %v148_v15 = vld [vmem:[%s1717_s1 + $0x78] sm:$0xff] }
   0x6   :  { %210 = vperm.xlu1 %740, %v136_v3   ;;  %200 = vperm.xlu0 %739, %v134_v4   ;;  %v147_v16 = vld [vmem:[%s1717_s1 + $0x70] sm:$0xff]  ;;  %v150_v17 = vld [vmem:[%s1717_s1 + $0x88] sm:$0xff]  ;;  %v149_v18 = vld [vmem:[%s1717_s1 + $0x80] sm:$0xff] }
   0x7   :  { %v152_v19 = vld [vmem:[%s1717_s1 + $0x98] sm:$0xff]  ;;  %v151_v20 = vld [vmem:[%s1717_s1 + $0x90] sm:$0xff]  ;;  %v154_v21 = vld [vmem:[%s1717_s1 + $0xa8] sm:$0xff] }
   0x8   :  { %v153_v22 = vld [vmem:[%s1717_s1 + $0xa0] sm:$0xff]  ;;  %v156_v23 = vld [vmem:[%s1717_s1 + $0xb8] sm:$0xff]  ;;  %v155_v24 = vld [vmem:[%s1717_s1 + $0xb0] sm:$0xff] }
   0x9   :  { %v158_v25 = vld [vmem:[%s1717_s1 + $0xc8] sm:$0xff]  ;;  %v157_v26 = vld [vmem:[%s1717_s1 + $0xc0] sm:$0xff]  ;;  %v160_v27 = vld [vmem:[%s1717_s1 + $0xd8] sm:$0xff] }
   0xa   :  { %220 = vperm.xlu1 %740, %v138_v5   ;;  %215 = vperm.xlu0 %739, %v137_v6   ;;  %v159_v28 = vld [vmem:[%s1717_s1 + $0xd0] sm:$0xff]  ;;  %v162_v29 = vld [vmem:[%s1717_s1 + $0xe8] sm:$0xff]  ;;  %v161_v30 = vld [vmem:[%s1717_s1 + $0xe0] sm:$0xff] }
   0xb   :  { %v164_v31 = vld [vmem:[%s1717_s1 + $0xf8] sm:$0xff]  ;;  %v163_v32 = vld [vmem:[%s1717_s1 + $0xf0] sm:$0xff]  ;;  %v166_v33 = vld [vmem:[%s1717_s1 + $0x108] sm:$0xff] }
   0xc   :  { %v165_v34 = vld [vmem:[%s1717_s1 + $0x100] sm:$0xff]  ;;  %v168_v35 = vld [vmem:[%s1717_s1 + $0x118] sm:$0xff]  ;;  %v167_v36 = vld [vmem:[%s1717_s1 + $0x110] sm:$0xff] }
   0xd   :  { %v170_v37 = vld [vmem:[%s1717_s1 + $0x128] sm:$0xff]  ;;  %v169_v38 = vld [vmem:[%s1717_s1 + $0x120] sm:$0xff]  ;;  %v172_v39 = vld [vmem:[%s1717_s1 + $0x138] sm:$0xff] }
   0xe   :  { %230 = vperm.xlu1 %740, %v140_v7   ;;  %225 = vperm.xlu0 %739, %v139_v8   ;;  %v171_v40 = vld [vmem:[%s1717_s1 + $0x130] sm:$0xff]  ;;  %v174_v41 = vld [vmem:[%s1717_s1 + $0x148] sm:$0xff]  ;;  %v173_v42 = vld [vmem:[%s1717_s1 + $0x140] sm:$0xff] }
   0xf   :  { %v176_v43 = vld [vmem:[%s1717_s1 + $0x158] sm:$0xff]  ;;  %v175_v44 = vld [vmem:[%s1717_s1 + $0x150] sm:$0xff]  ;;  %v178_v45 = vld [vmem:[%s1717_s1 + $0x168] sm:$0xff] }
  0x10   :  { %v177_v46 = vld [vmem:[%s1717_s1 + $0x160] sm:$0xff]  ;;  %v180_v47 = vld [vmem:[%s1717_s1 + $0x178] sm:$0xff]  ;;  %v179_v48 = vld [vmem:[%s1717_s1 + $0x170] sm:$0xff] }
  0x11   :  { %v182_v49 = vld [vmem:[%s1717_s1 + $0x188] sm:$0xff]  ;;  %v181_v50 = vld [vmem:[%s1717_s1 + $0x180] sm:$0xff]  ;;  %v184_v51 = vld [vmem:[%s1717_s1 + $0x198] sm:$0xff] }
  0x12   :  { %240 = vperm.xlu1 %740, %v142_v9   ;;  %235 = vperm.xlu0 %739, %v141_v10   ;;  %v183_v52 = vld [vmem:[%s1717_s1 + $0x190] sm:$0xff]  ;;  %v186_v53 = vld [vmem:[%s1717_s1 + $0x1a8] sm:$0xff]  ;;  %v185_v54 = vld [vmem:[%s1717_s1 + $0x1a0] sm:$0xff] }
  0x13   :  { %v188_v55 = vld [vmem:[%s1717_s1 + $0x1b8] sm:$0xff]  ;;  %v187_v56 = vld [vmem:[%s1717_s1 + $0x1b0] sm:$0xff]  ;;  %v190_v57 = vld [vmem:[%s1717_s1 + $0x1c8] sm:$0xff] }
  0x14   :  { %v189_v58 = vld [vmem:[%s1717_s1 + $0x1c0] sm:$0xff]  ;;  %v192_v59 = vld [vmem:[%s1717_s1 + $0x1d8] sm:$0xff]  ;;  %v191_v60 = vld [vmem:[%s1717_s1 + $0x1d0] sm:$0xff] }
  0x15   :  { %v16_v61 = vld [vmem:[%s1718_s0 + $0x20] sm:$0xff]  ;;  %v17_v62 = vld [vmem:[%s1718_s0 + $0x28] sm:$0xff]  ;;  %v18_v7 = vld [vmem:[%s1718_s0 + $0x30] sm:$0xff] }
  0x16   :  { %250 = vperm.xlu1 %740, %v144_v11   ;;  %245 = vperm.xlu0 %739, %v143_v12   ;;  %v12_v63 = vld [vmem:[%s1718_s0] sm:$0xff]  ;;  %v13_v0 = vld [vmem:[%s1718_s0 + $0x8] sm:$0xff]  ;;  %v19_v8 = vld [vmem:[%s1718_s0 + $0x38] sm:$0xff] }
  0x17   :  { %v14_v9 = vld [vmem:[%s1718_s0 + $0x10] sm:$0xff]  ;;  %v15_v10 = vld [vmem:[%s1718_s0 + $0x18] sm:$0xff] }
  0x1a   :  { %260 = vperm.xlu1 %740, %v146_v13   ;;  %255 = vperm.xlu0 %739, %v145_v14  }
  0x1e   :  { %270 = vperm.xlu1 %740, %v148_v15   ;;  %265 = vperm.xlu0 %739, %v147_v16  }
  0x22   :  { %280 = vperm.xlu1 %740, %v150_v17   ;;  %275 = vperm.xlu0 %739, %v149_v18   ;;  %v22_v17 = vld [vmem:[%s1718_s0 + $0x50] sm:$0xff]  ;;  %v23_v18 = vld [vmem:[%s1718_s0 + $0x58] sm:$0xff] }
  0x26   :  { %290 = vperm.xlu1 %740, %v152_v19   ;;  %285 = vperm.xlu0 %739, %v151_v20   ;;  %v20_v19 = vld [vmem:[%s1718_s0 + $0x40] sm:$0xff]  ;;  %v21_v20 = vld [vmem:[%s1718_s0 + $0x48] sm:$0xff] }
  0x2a   :  { %300 = vperm.xlu1 %740, %v154_v21   ;;  %295 = vperm.xlu0 %739, %v153_v22  }
  0x2e   :  { %310 = vperm.xlu1 %740, %v156_v23   ;;  %305 = vperm.xlu0 %739, %v155_v24  }
  0x32   :  { %320 = vperm.xlu1 %740, %v158_v25   ;;  %315 = vperm.xlu0 %739, %v157_v26  }
  0x36   :  { %330 = vperm.xlu1 %740, %v160_v27   ;;  %325 = vperm.xlu0 %739, %v159_v28   ;;  %v26_v27 = vld [vmem:[%s1718_s0 + $0x70] sm:$0xff]  ;;  %v27_v28 = vld [vmem:[%s1718_s0 + $0x78] sm:$0xff] }
  0x3a   :  { %340 = vperm.xlu1 %740, %v162_v29   ;;  %335 = vperm.xlu0 %739, %v161_v30   ;;  %v24_v29 = vld [vmem:[%s1718_s0 + $0x60] sm:$0xff]  ;;  %v25_v30 = vld [vmem:[%s1718_s0 + $0x68] sm:$0xff] }
  0x3e   :  { %350 = vperm.xlu1 %740, %v164_v31   ;;  %345 = vperm.xlu0 %739, %v163_v32  }
  0x42   :  { %360 = vperm.xlu1 %740, %v166_v33   ;;  %355 = vperm.xlu0 %739, %v165_v34  }
  0x46   :  { %370 = vperm.xlu1 %740, %v168_v35   ;;  %365 = vperm.xlu0 %739, %v167_v36  }
  0x4a   :  { %380 = vperm.xlu1 %740, %v170_v37   ;;  %375 = vperm.xlu0 %739, %v169_v38   ;;  %v30_v37 = vld [vmem:[%s1718_s0 + $0x90] sm:$0xff]  ;;  %v31_v38 = vld [vmem:[%s1718_s0 + $0x98] sm:$0xff] }
  0x4e   :  { %390 = vperm.xlu1 %740, %v172_v39   ;;  %385 = vperm.xlu0 %739, %v171_v40   ;;  %v28_v39 = vld [vmem:[%s1718_s0 + $0x80] sm:$0xff]  ;;  %v29_v40 = vld [vmem:[%s1718_s0 + $0x88] sm:$0xff] }
  0x52   :  { %400 = vperm.xlu1 %740, %v174_v41   ;;  %395 = vperm.xlu0 %739, %v173_v42  }
  0x56   :  { %410 = vperm.xlu1 %740, %v176_v43   ;;  %405 = vperm.xlu0 %739, %v175_v44  }
  0x5a   :  { %420 = vperm.xlu1 %740, %v178_v45   ;;  %415 = vperm.xlu0 %739, %v177_v46  }
  0x5e   :  { %430 = vperm.xlu1 %740, %v180_v47   ;;  %425 = vperm.xlu0 %739, %v179_v48   ;;  %v34_v47 = vld [vmem:[%s1718_s0 + $0xb0] sm:$0xff]  ;;  %v35_v48 = vld [vmem:[%s1718_s0 + $0xb8] sm:$0xff] }
  0x62   :  { %440 = vperm.xlu1 %740, %v182_v49   ;;  %435 = vperm.xlu0 %739, %v181_v50   ;;  %v32_v49 = vld [vmem:[%s1718_s0 + $0xa0] sm:$0xff]  ;;  %v33_v50 = vld [vmem:[%s1718_s0 + $0xa8] sm:$0xff] }
  0x66   :  { %450 = vperm.xlu1 %740, %v184_v51   ;;  %445 = vperm.xlu0 %739, %v183_v52  }
  0x6a   :  { %460 = vperm.xlu1 %740, %v186_v53   ;;  %455 = vperm.xlu0 %739, %v185_v54  }
  0x6e   :  { %470 = vperm.xlu1 %740, %v188_v55   ;;  %465 = vperm.xlu0 %739, %v187_v56  }
  0x72   :  { %480 = vperm.xlu1 %740, %v190_v57   ;;  %475 = vperm.xlu0 %739, %v189_v58   ;;  %v38_v57 = vld [vmem:[%s1718_s0 + $0xd0] sm:$0xff]  ;;  %v39_v58 = vld [vmem:[%s1718_s0 + $0xd8] sm:$0xff] }
  0x76   :  { %490 = vperm.xlu1 %740, %v192_v59   ;;  %485 = vperm.xlu0 %739, %v191_v60   ;;  %v36_v59 = vld [vmem:[%s1718_s0 + $0xc0] sm:$0xff]  ;;  %v37_v60 = vld [vmem:[%s1718_s0 + $0xc8] sm:$0xff] }
  0x81   :  { %v206_v1 = vpop.permute.xlu1 %205  ;;  %v196_v2 = vpop.permute.xlu0 %195 }
  0x82   :  { %v497_v3 = vmul.f32 %v206_v1, %v16_v61  ;;  %v498_v4 = vmul.f32 %v206_v1, %v17_v62  ;;  %v493_v5 = vmul.f32 %v196_v2, %v12_v63  ;;  %v494_v6 = vmul.f32 %v196_v2, %v13_v0 }
  0x84   :  { %618 = vst [vmem:[%s1719_s2 + $0x20] sm:$0xff] %v497_v3  ;;  %619 = vst.msk [vmem:[%s1719_s2 + $0x28] sm:$0xff] %vm614_vm0, %v498_v4  ;;  %v42_v3 = vld [vmem:[%s1718_s0 + $0xf0] sm:$0xff]  ;;  %v43_v4 = vld [vmem:[%s1718_s0 + $0xf8] sm:$0xff] }
  0x85   :  { %613 = vst [vmem:[%s1719_s2] sm:$0xff] %v493_v5  ;;  %615 = vst.msk [vmem:[%s1719_s2 + $0x8] sm:$0xff] %vm614_vm0, %v494_v6  ;;  %v211_v11 = vpop.permute.xlu1 %210  ;;  %v201_v12 = vpop.permute.xlu0 %200  ;;  %v40_v5 = vld [vmem:[%s1718_s0 + $0xe0] sm:$0xff]  ;;  %v41_v6 = vld [vmem:[%s1718_s0 + $0xe8] sm:$0xff] }
  0x86   :  { %v499_v13 = vmul.f32 %v211_v11, %v18_v7  ;;  %v500_v14 = vmul.f32 %v211_v11, %v19_v8  ;;  %v495_v15 = vmul.f32 %v201_v12, %v14_v9  ;;  %v496_v16 = vmul.f32 %v201_v12, %v15_v10 }
  0x88   :  { %620 = vst [vmem:[%s1719_s2 + $0x30] sm:$0xff] %v499_v13  ;;  %621 = vst.msk [vmem:[%s1719_s2 + $0x38] sm:$0xff] %vm614_vm0, %v500_v14  ;;  %v46_v13 = vld [vmem:[%s1718_s0 + $0x110] sm:$0xff]  ;;  %v47_v14 = vld [vmem:[%s1718_s0 + $0x118] sm:$0xff] }
  0x89   :  { %616 = vst [vmem:[%s1719_s2 + $0x10] sm:$0xff] %v495_v15  ;;  %617 = vst.msk [vmem:[%s1719_s2 + $0x18] sm:$0xff] %vm614_vm0, %v496_v16  ;;  %v221_v21 = vpop.permute.xlu1 %220  ;;  %v216_v22 = vpop.permute.xlu0 %215  ;;  %v44_v15 = vld [vmem:[%s1718_s0 + $0x100] sm:$0xff]  ;;  %v45_v16 = vld [vmem:[%s1718_s0 + $0x108] sm:$0xff] }
  0x8a   :  { %v503_v23 = vmul.f32 %v221_v21, %v22_v17  ;;  %v504_v24 = vmul.f32 %v221_v21, %v23_v18  ;;  %v501_v25 = vmul.f32 %v216_v22, %v20_v19  ;;  %v502_v26 = vmul.f32 %v216_v22, %v21_v20 }
  0x8c   :  { %624 = vst [vmem:[%s1719_s2 + $0x50] sm:$0xff] %v503_v23  ;;  %625 = vst.msk [vmem:[%s1719_s2 + $0x58] sm:$0xff] %vm614_vm0, %v504_v24  ;;  %v50_v23 = vld [vmem:[%s1718_s0 + $0x130] sm:$0xff]  ;;  %v51_v24 = vld [vmem:[%s1718_s0 + $0x138] sm:$0xff] }
  0x8d   :  { %622 = vst [vmem:[%s1719_s2 + $0x40] sm:$0xff] %v501_v25  ;;  %623 = vst.msk [vmem:[%s1719_s2 + $0x48] sm:$0xff] %vm614_vm0, %v502_v26  ;;  %v231_v31 = vpop.permute.xlu1 %230  ;;  %v226_v32 = vpop.permute.xlu0 %225  ;;  %v48_v25 = vld [vmem:[%s1718_s0 + $0x120] sm:$0xff]  ;;  %v49_v26 = vld [vmem:[%s1718_s0 + $0x128] sm:$0xff] }
  0x8e   :  { %v507_v33 = vmul.f32 %v231_v31, %v26_v27  ;;  %v508_v34 = vmul.f32 %v231_v31, %v27_v28  ;;  %v505_v35 = vmul.f32 %v226_v32, %v24_v29  ;;  %v506_v36 = vmul.f32 %v226_v32, %v25_v30 }
  0x90   :  { %628 = vst [vmem:[%s1719_s2 + $0x70] sm:$0xff] %v507_v33  ;;  %629 = vst.msk [vmem:[%s1719_s2 + $0x78] sm:$0xff] %vm614_vm0, %v508_v34  ;;  %v54_v33 = vld [vmem:[%s1718_s0 + $0x150] sm:$0xff]  ;;  %v55_v34 = vld [vmem:[%s1718_s0 + $0x158] sm:$0xff] }
  0x91   :  { %626 = vst [vmem:[%s1719_s2 + $0x60] sm:$0xff] %v505_v35  ;;  %627 = vst.msk [vmem:[%s1719_s2 + $0x68] sm:$0xff] %vm614_vm0, %v506_v36  ;;  %v241_v41 = vpop.permute.xlu1 %240  ;;  %v236_v42 = vpop.permute.xlu0 %235  ;;  %v52_v35 = vld [vmem:[%s1718_s0 + $0x140] sm:$0xff]  ;;  %v53_v36 = vld [vmem:[%s1718_s0 + $0x148] sm:$0xff] }
  0x92   :  { %v511_v43 = vmul.f32 %v241_v41, %v30_v37  ;;  %v512_v44 = vmul.f32 %v241_v41, %v31_v38  ;;  %v509_v45 = vmul.f32 %v236_v42, %v28_v39  ;;  %v510_v46 = vmul.f32 %v236_v42, %v29_v40 }
  0x94   :  { %632 = vst [vmem:[%s1719_s2 + $0x90] sm:$0xff] %v511_v43  ;;  %633 = vst.msk [vmem:[%s1719_s2 + $0x98] sm:$0xff] %vm614_vm0, %v512_v44  ;;  %v58_v43 = vld [vmem:[%s1718_s0 + $0x170] sm:$0xff]  ;;  %v59_v44 = vld [vmem:[%s1718_s0 + $0x178] sm:$0xff] }
  0x95   :  { %630 = vst [vmem:[%s1719_s2 + $0x80] sm:$0xff] %v509_v45  ;;  %631 = vst.msk [vmem:[%s1719_s2 + $0x88] sm:$0xff] %vm614_vm0, %v510_v46  ;;  %v251_v51 = vpop.permute.xlu1 %250  ;;  %v246_v52 = vpop.permute.xlu0 %245  ;;  %v56_v45 = vld [vmem:[%s1718_s0 + $0x160] sm:$0xff]  ;;  %v57_v46 = vld [vmem:[%s1718_s0 + $0x168] sm:$0xff] }
  0x96   :  { %v515_v53 = vmul.f32 %v251_v51, %v34_v47  ;;  %v516_v54 = vmul.f32 %v251_v51, %v35_v48  ;;  %v513_v55 = vmul.f32 %v246_v52, %v32_v49  ;;  %v514_v56 = vmul.f32 %v246_v52, %v33_v50 }
  0x98   :  { %636 = vst [vmem:[%s1719_s2 + $0xb0] sm:$0xff] %v515_v53  ;;  %637 = vst.msk [vmem:[%s1719_s2 + $0xb8] sm:$0xff] %vm614_vm0, %v516_v54  ;;  %v62_v53 = vld [vmem:[%s1718_s0 + $0x190] sm:$0xff]  ;;  %v63_v54 = vld [vmem:[%s1718_s0 + $0x198] sm:$0xff] }
  0x99   :  { %634 = vst [vmem:[%s1719_s2 + $0xa0] sm:$0xff] %v513_v55  ;;  %635 = vst.msk [vmem:[%s1719_s2 + $0xa8] sm:$0xff] %vm614_vm0, %v514_v56  ;;  %v261_v61 = vpop.permute.xlu1 %260  ;;  %v256_v62 = vpop.permute.xlu0 %255  ;;  %v60_v55 = vld [vmem:[%s1718_s0 + $0x180] sm:$0xff]  ;;  %v61_v56 = vld [vmem:[%s1718_s0 + $0x188] sm:$0xff] }
  0x9a   :  { %v519_v63 = vmul.f32 %v261_v61, %v38_v57  ;;  %v520_v0 = vmul.f32 %v261_v61, %v39_v58  ;;  %v517_v1 = vmul.f32 %v256_v62, %v36_v59  ;;  %v518_v2 = vmul.f32 %v256_v62, %v37_v60 }
  0x9c   :  { %640 = vst [vmem:[%s1719_s2 + $0xd0] sm:$0xff] %v519_v63  ;;  %641 = vst.msk [vmem:[%s1719_s2 + $0xd8] sm:$0xff] %vm614_vm0, %v520_v0  ;;  %v66_v63 = vld [vmem:[%s1718_s0 + $0x1b0] sm:$0xff]  ;;  %v67_v0 = vld [vmem:[%s1718_s0 + $0x1b8] sm:$0xff] }
  0x9d   :  { %638 = vst [vmem:[%s1719_s2 + $0xc0] sm:$0xff] %v517_v1  ;;  %639 = vst.msk [vmem:[%s1719_s2 + $0xc8] sm:$0xff] %vm614_vm0, %v518_v2  ;;  %v271_v7 = vpop.permute.xlu1 %270  ;;  %v266_v8 = vpop.permute.xlu0 %265  ;;  %v64_v1 = vld [vmem:[%s1718_s0 + $0x1a0] sm:$0xff]  ;;  %v65_v2 = vld [vmem:[%s1718_s0 + $0x1a8] sm:$0xff] }
  0x9e   :  { %v523_v9 = vmul.f32 %v271_v7, %v42_v3  ;;  %v524_v10 = vmul.f32 %v271_v7, %v43_v4  ;;  %v521_v11 = vmul.f32 %v266_v8, %v40_v5  ;;  %v522_v12 = vmul.f32 %v266_v8, %v41_v6 }
  0xa0   :  { %644 = vst [vmem:[%s1719_s2 + $0xf0] sm:$0xff] %v523_v9  ;;  %645 = vst.msk [vmem:[%s1719_s2 + $0xf8] sm:$0xff] %vm614_vm0, %v524_v10  ;;  %v70_v9 = vld [vmem:[%s1718_s0 + $0x1d0] sm:$0xff]  ;;  %v71_v10 = vld [vmem:[%s1718_s0 + $0x1d8] sm:$0xff] }
  0xa1   :  { %642 = vst [vmem:[%s1719_s2 + $0xe0] sm:$0xff] %v521_v11  ;;  %643 = vst.msk [vmem:[%s1719_s2 + $0xe8] sm:$0xff] %vm614_vm0, %v522_v12  ;;  %v281_v17 = vpop.permute.xlu1 %280  ;;  %v276_v18 = vpop.permute.xlu0 %275  ;;  %v68_v11 = vld [vmem:[%s1718_s0 + $0x1c0] sm:$0xff]  ;;  %v69_v12 = vld [vmem:[%s1718_s0 + $0x1c8] sm:$0xff] }
  0xa2   :  { %v527_v19 = vmul.f32 %v281_v17, %v46_v13  ;;  %v528_v20 = vmul.f32 %v281_v17, %v47_v14  ;;  %v525_v21 = vmul.f32 %v276_v18, %v44_v15  ;;  %v526_v22 = vmul.f32 %v276_v18, %v45_v16 }
  0xa4   :  { %648 = vst [vmem:[%s1719_s2 + $0x110] sm:$0xff] %v527_v19  ;;  %649 = vst.msk [vmem:[%s1719_s2 + $0x118] sm:$0xff] %vm614_vm0, %v528_v20  ;;  %v74_v19 = vld [vmem:[%s1718_s0 + $0x1f0] sm:$0xff]  ;;  %v75_v20 = vld [vmem:[%s1718_s0 + $0x1f8] sm:$0xff] }
  0xa5   :  { %646 = vst [vmem:[%s1719_s2 + $0x100] sm:$0xff] %v525_v21  ;;  %647 = vst.msk [vmem:[%s1719_s2 + $0x108] sm:$0xff] %vm614_vm0, %v526_v22  ;;  %v291_v27 = vpop.permute.xlu1 %290  ;;  %v286_v28 = vpop.permute.xlu0 %285  ;;  %v72_v21 = vld [vmem:[%s1718_s0 + $0x1e0] sm:$0xff]  ;;  %v73_v22 = vld [vmem:[%s1718_s0 + $0x1e8] sm:$0xff] }
  0xa6   :  { %v531_v29 = vmul.f32 %v291_v27, %v50_v23  ;;  %v532_v30 = vmul.f32 %v291_v27, %v51_v24  ;;  %v529_v31 = vmul.f32 %v286_v28, %v48_v25  ;;  %v530_v32 = vmul.f32 %v286_v28, %v49_v26 }
  0xa8   :  { %652 = vst [vmem:[%s1719_s2 + $0x130] sm:$0xff] %v531_v29  ;;  %653 = vst.msk [vmem:[%s1719_s2 + $0x138] sm:$0xff] %vm614_vm0, %v532_v30  ;;  %v78_v29 = vld [vmem:[%s1718_s0 + $0x210] sm:$0xff]  ;;  %v79_v30 = vld [vmem:[%s1718_s0 + $0x218] sm:$0xff] }
  0xa9   :  { %650 = vst [vmem:[%s1719_s2 + $0x120] sm:$0xff] %v529_v31  ;;  %651 = vst.msk [vmem:[%s1719_s2 + $0x128] sm:$0xff] %vm614_vm0, %v530_v32  ;;  %v301_v37 = vpop.permute.xlu1 %300  ;;  %v296_v38 = vpop.permute.xlu0 %295  ;;  %v76_v31 = vld [vmem:[%s1718_s0 + $0x200] sm:$0xff]  ;;  %v77_v32 = vld [vmem:[%s1718_s0 + $0x208] sm:$0xff] }
  0xaa   :  { %v535_v39 = vmul.f32 %v301_v37, %v54_v33  ;;  %v536_v40 = vmul.f32 %v301_v37, %v55_v34  ;;  %v533_v41 = vmul.f32 %v296_v38, %v52_v35  ;;  %v534_v42 = vmul.f32 %v296_v38, %v53_v36 }
  0xac   :  { %656 = vst [vmem:[%s1719_s2 + $0x150] sm:$0xff] %v535_v39  ;;  %657 = vst.msk [vmem:[%s1719_s2 + $0x158] sm:$0xff] %vm614_vm0, %v536_v40  ;;  %v82_v39 = vld [vmem:[%s1718_s0 + $0x230] sm:$0xff]  ;;  %v83_v40 = vld [vmem:[%s1718_s0 + $0x238] sm:$0xff] }
  0xad   :  { %654 = vst [vmem:[%s1719_s2 + $0x140] sm:$0xff] %v533_v41  ;;  %655 = vst.msk [vmem:[%s1719_s2 + $0x148] sm:$0xff] %vm614_vm0, %v534_v42  ;;  %v311_v47 = vpop.permute.xlu1 %310  ;;  %v306_v48 = vpop.permute.xlu0 %305  ;;  %v80_v41 = vld [vmem:[%s1718_s0 + $0x220] sm:$0xff]  ;;  %v81_v42 = vld [vmem:[%s1718_s0 + $0x228] sm:$0xff] }
  0xae   :  { %v539_v49 = vmul.f32 %v311_v47, %v58_v43  ;;  %v540_v50 = vmul.f32 %v311_v47, %v59_v44  ;;  %v537_v51 = vmul.f32 %v306_v48, %v56_v45  ;;  %v538_v52 = vmul.f32 %v306_v48, %v57_v46 }
  0xb0   :  { %660 = vst [vmem:[%s1719_s2 + $0x170] sm:$0xff] %v539_v49  ;;  %661 = vst.msk [vmem:[%s1719_s2 + $0x178] sm:$0xff] %vm614_vm0, %v540_v50  ;;  %v86_v49 = vld [vmem:[%s1718_s0 + $0x250] sm:$0xff]  ;;  %v87_v50 = vld [vmem:[%s1718_s0 + $0x258] sm:$0xff] }
  0xb1   :  { %658 = vst [vmem:[%s1719_s2 + $0x160] sm:$0xff] %v537_v51  ;;  %659 = vst.msk [vmem:[%s1719_s2 + $0x168] sm:$0xff] %vm614_vm0, %v538_v52  ;;  %v321_v57 = vpop.permute.xlu1 %320  ;;  %v316_v58 = vpop.permute.xlu0 %315  ;;  %v84_v51 = vld [vmem:[%s1718_s0 + $0x240] sm:$0xff]  ;;  %v85_v52 = vld [vmem:[%s1718_s0 + $0x248] sm:$0xff] }
  0xb2   :  { %v543_v59 = vmul.f32 %v321_v57, %v62_v53  ;;  %v544_v60 = vmul.f32 %v321_v57, %v63_v54  ;;  %v541_v61 = vmul.f32 %v316_v58, %v60_v55  ;;  %v542_v62 = vmul.f32 %v316_v58, %v61_v56 }
  0xb4   :  { %664 = vst [vmem:[%s1719_s2 + $0x190] sm:$0xff] %v543_v59  ;;  %665 = vst.msk [vmem:[%s1719_s2 + $0x198] sm:$0xff] %vm614_vm0, %v544_v60  ;;  %v90_v59 = vld [vmem:[%s1718_s0 + $0x270] sm:$0xff]  ;;  %v91_v60 = vld [vmem:[%s1718_s0 + $0x278] sm:$0xff] }
  0xb5   :  { %662 = vst [vmem:[%s1719_s2 + $0x180] sm:$0xff] %v541_v61  ;;  %663 = vst.msk [vmem:[%s1719_s2 + $0x188] sm:$0xff] %vm614_vm0, %v542_v62  ;;  %v331_v3 = vpop.permute.xlu1 %330  ;;  %v326_v4 = vpop.permute.xlu0 %325  ;;  %v88_v61 = vld [vmem:[%s1718_s0 + $0x260] sm:$0xff]  ;;  %v89_v62 = vld [vmem:[%s1718_s0 + $0x268] sm:$0xff] }
  0xb6   :  { %v547_v5 = vmul.f32 %v331_v3, %v66_v63  ;;  %v548_v6 = vmul.f32 %v331_v3, %v67_v0  ;;  %v545_v7 = vmul.f32 %v326_v4, %v64_v1  ;;  %v546_v8 = vmul.f32 %v326_v4, %v65_v2 }
  0xb8   :  { %668 = vst [vmem:[%s1719_s2 + $0x1b0] sm:$0xff] %v547_v5  ;;  %669 = vst.msk [vmem:[%s1719_s2 + $0x1b8] sm:$0xff] %vm614_vm0, %v548_v6  ;;  %v94_v5 = vld [vmem:[%s1718_s0 + $0x290] sm:$0xff]  ;;  %v95_v6 = vld [vmem:[%s1718_s0 + $0x298] sm:$0xff] }
  0xb9   :  { %666 = vst [vmem:[%s1719_s2 + $0x1a0] sm:$0xff] %v545_v7  ;;  %667 = vst.msk [vmem:[%s1719_s2 + $0x1a8] sm:$0xff] %vm614_vm0, %v546_v8  ;;  %v341_v13 = vpop.permute.xlu1 %340  ;;  %v336_v14 = vpop.permute.xlu0 %335  ;;  %v92_v7 = vld [vmem:[%s1718_s0 + $0x280] sm:$0xff]  ;;  %v93_v8 = vld [vmem:[%s1718_s0 + $0x288] sm:$0xff] }
  0xba   :  { %v551_v15 = vmul.f32 %v341_v13, %v70_v9  ;;  %v552_v16 = vmul.f32 %v341_v13, %v71_v10  ;;  %v549_v17 = vmul.f32 %v336_v14, %v68_v11  ;;  %v550_v18 = vmul.f32 %v336_v14, %v69_v12 }
  0xbc   :  { %672 = vst [vmem:[%s1719_s2 + $0x1d0] sm:$0xff] %v551_v15  ;;  %673 = vst.msk [vmem:[%s1719_s2 + $0x1d8] sm:$0xff] %vm614_vm0, %v552_v16  ;;  %v98_v15 = vld [vmem:[%s1718_s0 + $0x2b0] sm:$0xff]  ;;  %v99_v16 = vld [vmem:[%s1718_s0 + $0x2b8] sm:$0xff] }
  0xbd   :  { %670 = vst [vmem:[%s1719_s2 + $0x1c0] sm:$0xff] %v549_v17  ;;  %671 = vst.msk [vmem:[%s1719_s2 + $0x1c8] sm:$0xff] %vm614_vm0, %v550_v18  ;;  %v351_v23 = vpop.permute.xlu1 %350  ;;  %v346_v24 = vpop.permute.xlu0 %345  ;;  %v96_v17 = vld [vmem:[%s1718_s0 + $0x2a0] sm:$0xff]  ;;  %v97_v18 = vld [vmem:[%s1718_s0 + $0x2a8] sm:$0xff] }
  0xbe   :  { %v555_v25 = vmul.f32 %v351_v23, %v74_v19  ;;  %v556_v26 = vmul.f32 %v351_v23, %v75_v20  ;;  %v553_v27 = vmul.f32 %v346_v24, %v72_v21  ;;  %v554_v28 = vmul.f32 %v346_v24, %v73_v22 }
  0xc0   :  { %676 = vst [vmem:[%s1719_s2 + $0x1f0] sm:$0xff] %v555_v25  ;;  %677 = vst.msk [vmem:[%s1719_s2 + $0x1f8] sm:$0xff] %vm614_vm0, %v556_v26  ;;  %v102_v25 = vld [vmem:[%s1718_s0 + $0x2d0] sm:$0xff]  ;;  %v103_v26 = vld [vmem:[%s1718_s0 + $0x2d8] sm:$0xff] }
  0xc1   :  { %674 = vst [vmem:[%s1719_s2 + $0x1e0] sm:$0xff] %v553_v27  ;;  %675 = vst.msk [vmem:[%s1719_s2 + $0x1e8] sm:$0xff] %vm614_vm0, %v554_v28  ;;  %v361_v33 = vpop.permute.xlu1 %360  ;;  %v356_v34 = vpop.permute.xlu0 %355  ;;  %v100_v27 = vld [vmem:[%s1718_s0 + $0x2c0] sm:$0xff]  ;;  %v101_v28 = vld [vmem:[%s1718_s0 + $0x2c8] sm:$0xff] }
  0xc2   :  { %v559_v35 = vmul.f32 %v361_v33, %v78_v29  ;;  %v560_v36 = vmul.f32 %v361_v33, %v79_v30  ;;  %v557_v37 = vmul.f32 %v356_v34, %v76_v31  ;;  %v558_v38 = vmul.f32 %v356_v34, %v77_v32 }
  0xc4   :  { %680 = vst [vmem:[%s1719_s2 + $0x210] sm:$0xff] %v559_v35  ;;  %681 = vst.msk [vmem:[%s1719_s2 + $0x218] sm:$0xff] %vm614_vm0, %v560_v36  ;;  %v106_v35 = vld [vmem:[%s1718_s0 + $0x2f0] sm:$0xff]  ;;  %v107_v36 = vld [vmem:[%s1718_s0 + $0x2f8] sm:$0xff] }
  0xc5   :  { %678 = vst [vmem:[%s1719_s2 + $0x200] sm:$0xff] %v557_v37  ;;  %679 = vst.msk [vmem:[%s1719_s2 + $0x208] sm:$0xff] %vm614_vm0, %v558_v38  ;;  %v371_v43 = vpop.permute.xlu1 %370  ;;  %v366_v44 = vpop.permute.xlu0 %365  ;;  %v104_v37 = vld [vmem:[%s1718_s0 + $0x2e0] sm:$0xff]  ;;  %v105_v38 = vld [vmem:[%s1718_s0 + $0x2e8] sm:$0xff] }
  0xc6   :  { %v563_v45 = vmul.f32 %v371_v43, %v82_v39  ;;  %v564_v46 = vmul.f32 %v371_v43, %v83_v40  ;;  %v561_v47 = vmul.f32 %v366_v44, %v80_v41  ;;  %v562_v48 = vmul.f32 %v366_v44, %v81_v42 }
  0xc8   :  { %684 = vst [vmem:[%s1719_s2 + $0x230] sm:$0xff] %v563_v45  ;;  %685 = vst.msk [vmem:[%s1719_s2 + $0x238] sm:$0xff] %vm614_vm0, %v564_v46  ;;  %v110_v45 = vld [vmem:[%s1718_s0 + $0x310] sm:$0xff]  ;;  %v111_v46 = vld [vmem:[%s1718_s0 + $0x318] sm:$0xff] }
  0xc9   :  { %682 = vst [vmem:[%s1719_s2 + $0x220] sm:$0xff] %v561_v47  ;;  %683 = vst.msk [vmem:[%s1719_s2 + $0x228] sm:$0xff] %vm614_vm0, %v562_v48  ;;  %v381_v53 = vpop.permute.xlu1 %380  ;;  %v376_v54 = vpop.permute.xlu0 %375  ;;  %v108_v47 = vld [vmem:[%s1718_s0 + $0x300] sm:$0xff]  ;;  %v109_v48 = vld [vmem:[%s1718_s0 + $0x308] sm:$0xff] }
  0xca   :  { %v567_v55 = vmul.f32 %v381_v53, %v86_v49  ;;  %v568_v56 = vmul.f32 %v381_v53, %v87_v50  ;;  %v565_v57 = vmul.f32 %v376_v54, %v84_v51  ;;  %v566_v58 = vmul.f32 %v376_v54, %v85_v52 }
  0xcc   :  { %688 = vst [vmem:[%s1719_s2 + $0x250] sm:$0xff] %v567_v55  ;;  %689 = vst.msk [vmem:[%s1719_s2 + $0x258] sm:$0xff] %vm614_vm0, %v568_v56  ;;  %v114_v55 = vld [vmem:[%s1718_s0 + $0x330] sm:$0xff]  ;;  %v115_v56 = vld [vmem:[%s1718_s0 + $0x338] sm:$0xff] }
  0xcd   :  { %686 = vst [vmem:[%s1719_s2 + $0x240] sm:$0xff] %v565_v57  ;;  %687 = vst.msk [vmem:[%s1719_s2 + $0x248] sm:$0xff] %vm614_vm0, %v566_v58  ;;  %v391_v63 = vpop.permute.xlu1 %390  ;;  %v386_v0 = vpop.permute.xlu0 %385  ;;  %v112_v57 = vld [vmem:[%s1718_s0 + $0x320] sm:$0xff]  ;;  %v113_v58 = vld [vmem:[%s1718_s0 + $0x328] sm:$0xff] }
  0xce   :  { %v571_v1 = vmul.f32 %v391_v63, %v90_v59  ;;  %v572_v2 = vmul.f32 %v391_v63, %v91_v60  ;;  %v569_v3 = vmul.f32 %v386_v0, %v88_v61  ;;  %v570_v4 = vmul.f32 %v386_v0, %v89_v62 }
  0xd0   :  { %692 = vst [vmem:[%s1719_s2 + $0x270] sm:$0xff] %v571_v1  ;;  %693 = vst.msk [vmem:[%s1719_s2 + $0x278] sm:$0xff] %vm614_vm0, %v572_v2  ;;  %v118_v1 = vld [vmem:[%s1718_s0 + $0x350] sm:$0xff]  ;;  %v119_v2 = vld [vmem:[%s1718_s0 + $0x358] sm:$0xff] }
  0xd1   :  { %690 = vst [vmem:[%s1719_s2 + $0x260] sm:$0xff] %v569_v3  ;;  %691 = vst.msk [vmem:[%s1719_s2 + $0x268] sm:$0xff] %vm614_vm0, %v570_v4  ;;  %v401_v9 = vpop.permute.xlu1 %400  ;;  %v396_v10 = vpop.permute.xlu0 %395  ;;  %v116_v3 = vld [vmem:[%s1718_s0 + $0x340] sm:$0xff]  ;;  %v117_v4 = vld [vmem:[%s1718_s0 + $0x348] sm:$0xff] }
  0xd2   :  { %v575_v11 = vmul.f32 %v401_v9, %v94_v5  ;;  %v576_v12 = vmul.f32 %v401_v9, %v95_v6  ;;  %v573_v13 = vmul.f32 %v396_v10, %v92_v7  ;;  %v574_v14 = vmul.f32 %v396_v10, %v93_v8 }
  0xd4   :  { %696 = vst [vmem:[%s1719_s2 + $0x290] sm:$0xff] %v575_v11  ;;  %697 = vst.msk [vmem:[%s1719_s2 + $0x298] sm:$0xff] %vm614_vm0, %v576_v12  ;;  %v122_v11 = vld [vmem:[%s1718_s0 + $0x370] sm:$0xff]  ;;  %v123_v12 = vld [vmem:[%s1718_s0 + $0x378] sm:$0xff] }
  0xd5   :  { %694 = vst [vmem:[%s1719_s2 + $0x280] sm:$0xff] %v573_v13  ;;  %695 = vst.msk [vmem:[%s1719_s2 + $0x288] sm:$0xff] %vm614_vm0, %v574_v14  ;;  %v411_v19 = vpop.permute.xlu1 %410  ;;  %v406_v20 = vpop.permute.xlu0 %405  ;;  %v120_v13 = vld [vmem:[%s1718_s0 + $0x360] sm:$0xff]  ;;  %v121_v14 = vld [vmem:[%s1718_s0 + $0x368] sm:$0xff] }
  0xd6   :  { %v579_v21 = vmul.f32 %v411_v19, %v98_v15  ;;  %v580_v22 = vmul.f32 %v411_v19, %v99_v16  ;;  %v577_v23 = vmul.f32 %v406_v20, %v96_v17  ;;  %v578_v24 = vmul.f32 %v406_v20, %v97_v18 }
  0xd8   :  { %700 = vst [vmem:[%s1719_s2 + $0x2b0] sm:$0xff] %v579_v21  ;;  %701 = vst.msk [vmem:[%s1719_s2 + $0x2b8] sm:$0xff] %vm614_vm0, %v580_v22  ;;  %v126_v21 = vld [vmem:[%s1718_s0 + $0x390] sm:$0xff]  ;;  %v127_v22 = vld [vmem:[%s1718_s0 + $0x398] sm:$0xff] }
  0xd9   :  { %698 = vst [vmem:[%s1719_s2 + $0x2a0] sm:$0xff] %v577_v23  ;;  %699 = vst.msk [vmem:[%s1719_s2 + $0x2a8] sm:$0xff] %vm614_vm0, %v578_v24  ;;  %v421_v29 = vpop.permute.xlu1 %420  ;;  %v416_v30 = vpop.permute.xlu0 %415  ;;  %v124_v23 = vld [vmem:[%s1718_s0 + $0x380] sm:$0xff]  ;;  %v125_v24 = vld [vmem:[%s1718_s0 + $0x388] sm:$0xff] }
  0xda   :  { %v583_v31 = vmul.f32 %v421_v29, %v102_v25  ;;  %v584_v32 = vmul.f32 %v421_v29, %v103_v26  ;;  %v581_v33 = vmul.f32 %v416_v30, %v100_v27  ;;  %v582_v34 = vmul.f32 %v416_v30, %v101_v28 }
  0xdc   :  { %704 = vst [vmem:[%s1719_s2 + $0x2d0] sm:$0xff] %v583_v31  ;;  %705 = vst.msk [vmem:[%s1719_s2 + $0x2d8] sm:$0xff] %vm614_vm0, %v584_v32  ;;  %v130_v31 = vld [vmem:[%s1718_s0 + $0x3b0] sm:$0xff]  ;;  %v131_v32 = vld [vmem:[%s1718_s0 + $0x3b8] sm:$0xff] }
  0xdd   :  { %702 = vst [vmem:[%s1719_s2 + $0x2c0] sm:$0xff] %v581_v33  ;;  %703 = vst.msk [vmem:[%s1719_s2 + $0x2c8] sm:$0xff] %vm614_vm0, %v582_v34  ;;  %v431_v39 = vpop.permute.xlu1 %430  ;;  %v426_v40 = vpop.permute.xlu0 %425  ;;  %v128_v33 = vld [vmem:[%s1718_s0 + $0x3a0] sm:$0xff]  ;;  %v129_v34 = vld [vmem:[%s1718_s0 + $0x3a8] sm:$0xff] }
  0xde   :  { %v587_v41 = vmul.f32 %v431_v39, %v106_v35  ;;  %v588_v42 = vmul.f32 %v431_v39, %v107_v36  ;;  %v585_v43 = vmul.f32 %v426_v40, %v104_v37  ;;  %v586_v44 = vmul.f32 %v426_v40, %v105_v38 }
  0xe0   :  { %708 = vst [vmem:[%s1719_s2 + $0x2f0] sm:$0xff] %v587_v41  ;;  %709 = vst.msk [vmem:[%s1719_s2 + $0x2f8] sm:$0xff] %vm614_vm0, %v588_v42 }
  0xe1   :  { %706 = vst [vmem:[%s1719_s2 + $0x2e0] sm:$0xff] %v585_v43  ;;  %707 = vst.msk [vmem:[%s1719_s2 + $0x2e8] sm:$0xff] %vm614_vm0, %v586_v44  ;;  %v441_v49 = vpop.permute.xlu1 %440  ;;  %v436_v50 = vpop.permute.xlu0 %435 }
  0xe2   :  { %v591_v51 = vmul.f32 %v441_v49, %v110_v45  ;;  %v592_v52 = vmul.f32 %v441_v49, %v111_v46  ;;  %v589_v53 = vmul.f32 %v436_v50, %v108_v47  ;;  %v590_v54 = vmul.f32 %v436_v50, %v109_v48 }
  0xe4   :  { %712 = vst [vmem:[%s1719_s2 + $0x310] sm:$0xff] %v591_v51  ;;  %713 = vst.msk [vmem:[%s1719_s2 + $0x318] sm:$0xff] %vm614_vm0, %v592_v52 }
  0xe5   :  { %710 = vst [vmem:[%s1719_s2 + $0x300] sm:$0xff] %v589_v53  ;;  %711 = vst.msk [vmem:[%s1719_s2 + $0x308] sm:$0xff] %vm614_vm0, %v590_v54  ;;  %v451_v59 = vpop.permute.xlu1 %450  ;;  %v446_v60 = vpop.permute.xlu0 %445 }
  0xe6   :  { %v595_v61 = vmul.f32 %v451_v59, %v114_v55  ;;  %v596_v62 = vmul.f32 %v451_v59, %v115_v56  ;;  %v593_v63 = vmul.f32 %v446_v60, %v112_v57  ;;  %v594_v0 = vmul.f32 %v446_v60, %v113_v58 }
  0xe8   :  { %716 = vst [vmem:[%s1719_s2 + $0x330] sm:$0xff] %v595_v61  ;;  %717 = vst.msk [vmem:[%s1719_s2 + $0x338] sm:$0xff] %vm614_vm0, %v596_v62 }
  0xe9   :  { %714 = vst [vmem:[%s1719_s2 + $0x320] sm:$0xff] %v593_v63  ;;  %715 = vst.msk [vmem:[%s1719_s2 + $0x328] sm:$0xff] %vm614_vm0, %v594_v0  ;;  %v461_v5 = vpop.permute.xlu1 %460  ;;  %v456_v6 = vpop.permute.xlu0 %455 }
  0xea   :  { %v599_v7 = vmul.f32 %v461_v5, %v118_v1  ;;  %v600_v8 = vmul.f32 %v461_v5, %v119_v2  ;;  %v597_v9 = vmul.f32 %v456_v6, %v116_v3  ;;  %v598_v10 = vmul.f32 %v456_v6, %v117_v4 }
  0xec   :  { %720 = vst [vmem:[%s1719_s2 + $0x350] sm:$0xff] %v599_v7  ;;  %721 = vst.msk [vmem:[%s1719_s2 + $0x358] sm:$0xff] %vm614_vm0, %v600_v8 }
  0xed   :  { %718 = vst [vmem:[%s1719_s2 + $0x340] sm:$0xff] %v597_v9  ;;  %719 = vst.msk [vmem:[%s1719_s2 + $0x348] sm:$0xff] %vm614_vm0, %v598_v10  ;;  %v471_v15 = vpop.permute.xlu1 %470  ;;  %v466_v16 = vpop.permute.xlu0 %465 }
  0xee   :  { %v603_v17 = vmul.f32 %v471_v15, %v122_v11  ;;  %v604_v18 = vmul.f32 %v471_v15, %v123_v12  ;;  %v601_v19 = vmul.f32 %v466_v16, %v120_v13  ;;  %v602_v20 = vmul.f32 %v466_v16, %v121_v14 }
  0xf0   :  { %724 = vst [vmem:[%s1719_s2 + $0x370] sm:$0xff] %v603_v17  ;;  %725 = vst.msk [vmem:[%s1719_s2 + $0x378] sm:$0xff] %vm614_vm0, %v604_v18 }
  0xf1   :  { %722 = vst [vmem:[%s1719_s2 + $0x360] sm:$0xff] %v601_v19  ;;  %723 = vst.msk [vmem:[%s1719_s2 + $0x368] sm:$0xff] %vm614_vm0, %v602_v20  ;;  %v481_v25 = vpop.permute.xlu1 %480  ;;  %v476_v26 = vpop.permute.xlu0 %475 }
  0xf2   :  { %v607_v27 = vmul.f32 %v481_v25, %v126_v21  ;;  %v608_v28 = vmul.f32 %v481_v25, %v127_v22  ;;  %v605_v29 = vmul.f32 %v476_v26, %v124_v23  ;;  %v606_v30 = vmul.f32 %v476_v26, %v125_v24 }
  0xf4   :  { %728 = vst [vmem:[%s1719_s2 + $0x390] sm:$0xff] %v607_v27  ;;  %729 = vst.msk [vmem:[%s1719_s2 + $0x398] sm:$0xff] %vm614_vm0, %v608_v28 }
  0xf5   :  { %726 = vst [vmem:[%s1719_s2 + $0x380] sm:$0xff] %v605_v29  ;;  %727 = vst.msk [vmem:[%s1719_s2 + $0x388] sm:$0xff] %vm614_vm0, %v606_v30  ;;  %v491_v35 = vpop.permute.xlu1 %490  ;;  %v486_v36 = vpop.permute.xlu0 %485 }
  0xf6   :  { %v611_v37 = vmul.f32 %v491_v35, %v130_v31  ;;  %v612_v38 = vmul.f32 %v491_v35, %v131_v32  ;;  %v609_v39 = vmul.f32 %v486_v36, %v128_v33  ;;  %v610_v40 = vmul.f32 %v486_v36, %v129_v34 }
  0xf8   :  { %732 = vst [vmem:[%s1719_s2 + $0x3b0] sm:$0xff] %v611_v37  ;;  %733 = vst.msk [vmem:[%s1719_s2 + $0x3b8] sm:$0xff] %vm614_vm0, %v612_v38 }
  0xf9   :  { %730 = vst [vmem:[%s1719_s2 + $0x3a0] sm:$0xff] %v609_v39  ;;  %731 = vst.msk [vmem:[%s1719_s2 + $0x3a8] sm:$0xff] %vm614_vm0, %v610_v40 }

</bundles_post_ra>
